<compile_context>
chip_gen: v7x
topology: tpu7x:2x2x1
jax: 0.10.0
libtpu: 0.0.40
codegen_flags: <defaults>
</compile_context>

<pallas_src>
from functools import partial

import jax
import jax.numpy as jnp
from jax.experimental import pallas as pl
from jax.experimental.pallas import tpu as pltpu


def dqn_kernel(x_ref, w_ref, b_ref, out_ref):
    """Whole forward pass in one invocation: 5 MXU matmuls + VPU bias/ReLU.

    x_ref:   [batch, d_in]      f32 (natural shape; Mosaic pads internally)
    w_ref:   [5, 128, 128]      bf16 (fc1..fc4, fused heads; zero-padded)
    b_ref:   [8, 128]           f32 (rows 0..3 trunk, row 4 fused heads)
    out_ref: [batch, 128]       f32 (lanes 0..5*dim_action-1 are the 5 heads)
    """
    d_in = x_ref.shape[1]
    cdt = w_ref.dtype  # bf16 dot operands, f32 accumulate / elementwise

    # fc1 + relu: statically slice the stacked fc1 weight back to its true K
    # (padded rows are zero, so this is exact), avoiding any x padding.
    x = x_ref[...].astype(cdt)
    h = jnp.dot(x, w_ref[0, :d_in, :], preferred_element_type=jnp.float32) + b_ref[0:1, :]
    h = jnp.maximum(h, 0.0)

    # fc2, fc3, fc4 + relu (128x128 padded; padded lanes stay exactly 0).
    for i in (1, 2, 3):
        h = jnp.dot(h.astype(cdt), w_ref[i], preferred_element_type=jnp.float32) + b_ref[i:i + 1, :]
        h = jnp.maximum(h, 0.0)

    # Fused output heads out_msg1..5: one matmul, one lane-dense unmasked store.
    out_ref[...] = (
        jnp.dot(h.astype(cdt), w_ref[4], preferred_element_type=jnp.float32) + b_ref[4:5, :]
    )


def make_dqn_params(key, dim_observation, dim_action):
    """Deterministic synthetic parameters mirroring the PyTorch __init__ shapes.

    Weights ~ N(0, 0.1) (as in the module); biases use PyTorch Linear's default
    U(-1/sqrt(fan_in), 1/sqrt(fan_in)). Weights are returned as [in, out].
    """
    d_in = dim_observation * 10
    layer_dims = [
        (d_in, 128), (128, 64), (64, 32), (32, 32),             # fc1..fc4
        (32, dim_action), (32, dim_action), (32, dim_action),   # out_msg1..3
        (32, dim_action), (32, dim_action),                     # out_msg4..5
    ]
    params = []
    for (fan_in, fan_out) in layer_dims:
        key, kw, kb = jax.random.split(key, 3)
        w = 0.1 * jax.random.normal(kw, (fan_in, fan_out), dtype=jnp.float32)
        bound = 1.0 / jnp.sqrt(jnp.float32(fan_in))
        b = jax.random.uniform(kb, (1, fan_out), dtype=jnp.float32,
                               minval=-bound, maxval=bound)
        params.append((w, b))
    return params


def pack_dqn_params(params, dim_action, weight_dtype=jnp.bfloat16):
    """Pack the 9 (w, b) pairs into 2 padded operands: w_stack[5,128,128], b_all[8,128]."""
    n_head = 5 * dim_action
    # TODO(synk): for 5*dim_action > 128 the fused head would need its own operand
    # padded to a multiple of 128 lanes; not needed at these sizes.
    assert n_head <= 128, "fused head width must fit in 128 lanes"

    d_in = params[0][0].shape[0]
    assert d_in <= 128, "fc1 input width must fit in one 128-lane tile to fold w1"

    # fc1..fc4 weights zero-padded into rows 0..3 of one [5, 128, 128] stack.
    w_stack = jnp.zeros((5, 128, 128), jnp.float32)
    for i, (w, _) in enumerate(params[:4]):
        fi, fo = w.shape
        w_stack = w_stack.at[i, :fi, :fo].set(w)
    # Fused head weight into row 4.
    w_head = jnp.concatenate([w for (w, _) in params[4:]], axis=1)      # [32, 5A]
    w_stack = w_stack.at[4, :32, :n_head].set(w_head)
    w_stack = w_stack.astype(weight_dtype)

    # Biases: rows 0..3 trunk, row 4 fused head; padded lanes are 0 so padded
    # activations stay exactly 0 through the ReLU chain.
    b_all = jnp.zeros((8, 128), jnp.float32)
    for i, (_, b) in enumerate(params[:4]):
        b_all = b_all.at[i, : b.shape[1]].set(b[0])
    b_head = jnp.concatenate([b[0] for (_, b) in params[4:]], axis=0)   # [5A]
    b_all = b_all.at[4, :n_head].set(b_head)

    return w_stack, b_all


@partial(jax.jit, static_argnames=("dim_action",))
def dqn_forward(x, w_stack, b_all, *, dim_action):
    """Returns a stacked (batch, 5, dim_action) array of the 5 head outputs."""
    batch = x.shape[0]
    vmem = pl.BlockSpec(memory_space=pltpu.MemorySpace.VMEM)
    out = pl.pallas_call(
        dqn_kernel,
        out_shape=jax.ShapeDtypeStruct((batch, 128), jnp.float32),
        in_specs=[vmem, vmem, vmem],
        out_specs=vmem,
        # No grid: the whole problem fits in VMEM with huge headroom; any
        # tiling/pipelining machinery would be pure per-step overhead here.
    )(x, w_stack, b_all)
    # Single slice + single reshape epilogue (no 5 separate slice HLOs).
    return out[:, : 5 * dim_action].reshape(batch, 5, dim_action)


def dqn_forward_ref_f32(x, params):
    """Pure-JAX f32 reference (unpacked params)."""
    h = x
    for (w, b) in params[:4]:
        h = jnp.maximum(h @ w + b, 0.0)
    return tuple(h @ w + b for (w, b) in params[4:])


def dqn_forward_ref_bf16(x, params):
    """Pure-JAX reference with the same bf16-dot / f32-accumulate recipe as the kernel."""
    h = x
    for (w, b) in params[:4]:
        h = jnp.dot(h.astype(jnp.bfloat16), w.astype(jnp.bfloat16),
                    preferred_element_type=jnp.float32) + b
        h = jnp.maximum(h, 0.0)
    return tuple(
        jnp.dot(h.astype(jnp.bfloat16), w.astype(jnp.bfloat16),
                preferred_element_type=jnp.float32) + b
        for (w, b) in params[4:]
    )


if __name__ == "__main__":
    dim_observation = 8      # -> fc1 input dim = 80
    dim_action = 4
    batch = 2

    key = jax.random.PRNGKey(0)
    key, kx = jax.random.split(key)
    x = jax.random.normal(kx, (batch, dim_observation * 10), dtype=jnp.float32)
    params = make_dqn_params(key, dim_observation, dim_action)

    w_stack, b_all = pack_dqn_params(params, dim_action)

    q = dqn_forward(x, w_stack, b_all, dim_action=dim_action)     # (batch, 5, dim_action)
    q = jax.block_until_ready(q)
    assert q.shape == (batch, 5, dim_action)

    # Module-semantics 5-tuple (consumer-side unpack, outside the jitted compute).
    outs = tuple(q[:, i, :] for i in range(5))

    refs_bf16 = dqn_forward_ref_bf16(x, params)
    refs_f32 = dqn_forward_ref_f32(x, params)
    for o, rb, rf in zip(outs, refs_bf16, refs_f32):
        assert o.shape == (batch, dim_action)
        # Tight check against a reference using the identical bf16-dot recipe.
        assert jnp.allclose(o, rb, atol=2e-3, rtol=2e-3)
        # Looser check against the exact f32 math (bf16 dot-operand rounding).
        assert jnp.allclose(o, rf, atol=5e-2, rtol=5e-2)

    print("KERNEL_OK")
</pallas_src>

<mosaic_0001>
module attributes {stable_mosaic.version = 11 : i64} {
  func.func @dqn_kernel(%arg0: memref<2x80xf32, #tpu.memory_space<vmem>>, %arg1: memref<5x128x128xbf16, #tpu.memory_space<vmem>>, %arg2: memref<8x128xf32, #tpu.memory_space<vmem>>, %arg3: memref<2x128xf32, #tpu.memory_space<vmem>>) attributes {dimension_semantics = [], scalar_prefetch = 0 : i64, scratch_operands = 0 : i64, tpu.core_type = #tpu.core_type<tc>} {
    %c0 = arith.constant 0 : index
    %c0_0 = arith.constant 0 : index
    %0 = vector.load %arg0[%c0, %c0_0] : memref<2x80xf32, #tpu.memory_space<vmem>>, vector<2x80xf32>
    %1 = arith.truncf %0 : vector<2x80xf32> to vector<2x80xbf16>
    %c0_1 = arith.constant 0 : index
    %c0_2 = arith.constant 0 : index
    %c0_3 = arith.constant 0 : index
    %2 = vector.load %arg1[%c0_1, %c0_2, %c0_3] : memref<5x128x128xbf16, #tpu.memory_space<vmem>>, vector<1x80x128xbf16>
    %3 = vector.shape_cast %2 : vector<1x80x128xbf16> to vector<80x128xbf16>
    %cst = arith.constant dense<0.000000e+00> : vector<2x128xf32>
    %4 = tpu.matmul %1, %3, %cst {dimension_numbers = #tpu.dot_dimension_numbers<[1], [0], [0], [1], [0, 0, 1, 1], [], []>} : vector<2x80xbf16>, vector<80x128xbf16>, vector<2x128xf32> -> vector<2x128xf32>
    %c0_4 = arith.constant 0 : index
    %c0_5 = arith.constant 0 : index
    %5 = vector.load %arg2[%c0_4, %c0_5] : memref<8x128xf32, #tpu.memory_space<vmem>>, vector<1x128xf32>
    %6 = vector.broadcast %5 : vector<1x128xf32> to vector<2x128xf32>
    %7 = arith.addf %4, %6 : vector<2x128xf32>
    %cst_6 = arith.constant 0.000000e+00 : f32
    %8 = vector.broadcast %cst_6 : f32 to vector<2x128xf32>
    %9 = arith.maximumf %7, %8 : vector<2x128xf32>
    %10 = arith.truncf %9 : vector<2x128xf32> to vector<2x128xbf16>
    %c1 = arith.constant 1 : index
    %c0_7 = arith.constant 0 : index
    %c0_8 = arith.constant 0 : index
    %11 = vector.load %arg1[%c1, %c0_7, %c0_8] : memref<5x128x128xbf16, #tpu.memory_space<vmem>>, vector<1x128x128xbf16>
    %12 = vector.shape_cast %11 : vector<1x128x128xbf16> to vector<128x128xbf16>
    %cst_9 = arith.constant dense<0.000000e+00> : vector<2x128xf32>
    %13 = tpu.matmul %10, %12, %cst_9 {dimension_numbers = #tpu.dot_dimension_numbers<[1], [0], [0], [1], [0, 0, 1, 1], [], []>} : vector<2x128xbf16>, vector<128x128xbf16>, vector<2x128xf32> -> vector<2x128xf32>
    %c1_10 = arith.constant 1 : index
    %c0_11 = arith.constant 0 : index
    %14 = vector.load %arg2[%c1_10, %c0_11] : memref<8x128xf32, #tpu.memory_space<vmem>>, vector<1x128xf32>
    %15 = vector.broadcast %14 : vector<1x128xf32> to vector<2x128xf32>
    %16 = arith.addf %13, %15 : vector<2x128xf32>
    %cst_12 = arith.constant 0.000000e+00 : f32
    %17 = vector.broadcast %cst_12 : f32 to vector<2x128xf32>
    %18 = arith.maximumf %16, %17 : vector<2x128xf32>
    %19 = arith.truncf %18 : vector<2x128xf32> to vector<2x128xbf16>
    %c2 = arith.constant 2 : index
    %c0_13 = arith.constant 0 : index
    %c0_14 = arith.constant 0 : index
    %20 = vector.load %arg1[%c2, %c0_13, %c0_14] : memref<5x128x128xbf16, #tpu.memory_space<vmem>>, vector<1x128x128xbf16>
    %21 = vector.shape_cast %20 : vector<1x128x128xbf16> to vector<128x128xbf16>
    %cst_15 = arith.constant dense<0.000000e+00> : vector<2x128xf32>
    %22 = tpu.matmul %19, %21, %cst_15 {dimension_numbers = #tpu.dot_dimension_numbers<[1], [0], [0], [1], [0, 0, 1, 1], [], []>} : vector<2x128xbf16>, vector<128x128xbf16>, vector<2x128xf32> -> vector<2x128xf32>
    %c2_16 = arith.constant 2 : index
    %c0_17 = arith.constant 0 : index
    %23 = vector.load %arg2[%c2_16, %c0_17] : memref<8x128xf32, #tpu.memory_space<vmem>>, vector<1x128xf32>
    %24 = vector.broadcast %23 : vector<1x128xf32> to vector<2x128xf32>
    %25 = arith.addf %22, %24 : vector<2x128xf32>
    %cst_18 = arith.constant 0.000000e+00 : f32
    %26 = vector.broadcast %cst_18 : f32 to vector<2x128xf32>
    %27 = arith.maximumf %25, %26 : vector<2x128xf32>
    %28 = arith.truncf %27 : vector<2x128xf32> to vector<2x128xbf16>
    %c3 = arith.constant 3 : index
    %c0_19 = arith.constant 0 : index
    %c0_20 = arith.constant 0 : index
    %29 = vector.load %arg1[%c3, %c0_19, %c0_20] : memref<5x128x128xbf16, #tpu.memory_space<vmem>>, vector<1x128x128xbf16>
    %30 = vector.shape_cast %29 : vector<1x128x128xbf16> to vector<128x128xbf16>
    %cst_21 = arith.constant dense<0.000000e+00> : vector<2x128xf32>
    %31 = tpu.matmul %28, %30, %cst_21 {dimension_numbers = #tpu.dot_dimension_numbers<[1], [0], [0], [1], [0, 0, 1, 1], [], []>} : vector<2x128xbf16>, vector<128x128xbf16>, vector<2x128xf32> -> vector<2x128xf32>
    %c3_22 = arith.constant 3 : index
    %c0_23 = arith.constant 0 : index
    %32 = vector.load %arg2[%c3_22, %c0_23] : memref<8x128xf32, #tpu.memory_space<vmem>>, vector<1x128xf32>
    %33 = vector.broadcast %32 : vector<1x128xf32> to vector<2x128xf32>
    %34 = arith.addf %31, %33 : vector<2x128xf32>
    %cst_24 = arith.constant 0.000000e+00 : f32
    %35 = vector.broadcast %cst_24 : f32 to vector<2x128xf32>
    %36 = arith.maximumf %34, %35 : vector<2x128xf32>
    %37 = arith.truncf %36 : vector<2x128xf32> to vector<2x128xbf16>
    %c4 = arith.constant 4 : index
    %c0_25 = arith.constant 0 : index
    %c0_26 = arith.constant 0 : index
    %38 = vector.load %arg1[%c4, %c0_25, %c0_26] : memref<5x128x128xbf16, #tpu.memory_space<vmem>>, vector<1x128x128xbf16>
    %39 = vector.shape_cast %38 : vector<1x128x128xbf16> to vector<128x128xbf16>
    %cst_27 = arith.constant dense<0.000000e+00> : vector<2x128xf32>
    %40 = tpu.matmul %37, %39, %cst_27 {dimension_numbers = #tpu.dot_dimension_numbers<[1], [0], [0], [1], [0, 0, 1, 1], [], []>} : vector<2x128xbf16>, vector<128x128xbf16>, vector<2x128xf32> -> vector<2x128xf32>
    %c4_28 = arith.constant 4 : index
    %c0_29 = arith.constant 0 : index
    %41 = vector.load %arg2[%c4_28, %c0_29] : memref<8x128xf32, #tpu.memory_space<vmem>>, vector<1x128xf32>
    %42 = vector.broadcast %41 : vector<1x128xf32> to vector<2x128xf32>
    %43 = arith.addf %40, %42 : vector<2x128xf32>
    %c0_30 = arith.constant 0 : index
    %c0_31 = arith.constant 0 : index
    %44 = vector.load %arg3[%c0_30, %c0_31] : memref<2x128xf32, #tpu.memory_space<vmem>>, vector<2x128xf32>
    tpu.vector_store %arg3[%c0_30, %c0_31], %43 {strides = array<i32>} : memref<2x128xf32, #tpu.memory_space<vmem>>, vector<2x128xf32>,
    return
  }
}

</mosaic_0001>

<bundles_post_ra>
// kernel: dqn_forward.1
= control target key start
LH: loop header
LB: loop body
LE: loop exit
PB: predicated region body
PF: predicated region fallthrough
CT: control target
= control target key end

     0   :  { %8 = vsyncpa [#allocation3], 0  ;;  %s1005_s0 = inlined_call_operand.hbm [shape: f32[2,80], index: 0, kind: input, shape index: {}]   ;;  %s1006_s1 = inlined_call_operand.hbm [shape: bf16[5,128,128], index: 1, kind: input, shape index: {}]   ;;  %s1007_s2 = inlined_call_operand.hbm [shape: f32[8,128], index: 2, kind: input, shape index: {}]   ;;  %s1008_s3 = inlined_call_operand.vmem [shape: f32[2,128], index: 3, kind: output, shape index: {}]  }
   0x1   :  { %9 = vsyncpa [#allocation5], 0  ;;  %s891_s12 = smov [#allocation4]   ;;  %s821_s16 = scalar_lea.hbm %s1006_s1, 5120 }
   0x2   :  { %s25_s13 = sshll.u32 %s891_s12, 4  ;;  %p822_p0 = scmp.ne.s32.totalorder %s1006_s1, %s821_s16  ;;  %s26_s13 = int_to_ptr.vmem [resolvable:$true] %s25_s13 }
   0x3   :  { %p825_p1 = scmp.lt.u32.totalorder %s821_s16, %s1006_s1 }
   0x5   :  { %p827_p2 = pnand %p825_p1, %p822_p0 }
   0x7   :  { %830 = shalt.err (!%p827_p2)
}
   0x8   :  { %s831_s21 = scalar_lea.vmem %s26_s13, 5120  ;;  %p836_p4 = scmp.lt.s32.totalorder %s26_s13, %s26_s13 }
   0x9   :  { %p832_p3 = scmp.ne.s32.totalorder %s26_s13, %s831_s21  ;;  %p837_p5 = scmp.lt.s32.totalorder %s831_s21, %s831_s21 }
   0xb   :  { %p838_p6 = por %p837_p5, %p836_p4 }
   0xd   :  { %p839_p7 = pnand %p838_p6, %p832_p3 }
   0xf   :  { %842 = shalt.err (!%p839_p7)
}
  0x10   :  { %s892_s22 = smov 64   ;;  %s893_s23 = smov 4  }
  0x11   :  { %31 = dma.hbm_to_vmem [thread:$0]  %s1006_s1, 5120, %s26_s13, [#allocation5], %s892_s22, %s892_s22, %s893_s23  }
  0x12   :  { %s894_s26 = smov [#allocation2]   ;;  %s895_s28 = smov [#allocation6]  }
  0x13   :  { %s16_s27 = sshll.u32 %s894_s26, 4  ;;  %s38_s29 = sshll.u32 %s895_s28, 4  ;;  %s17_s27 = int_to_ptr.vmem [resolvable:$true] %s16_s27  ;;  %s39_s29 = int_to_ptr.vmem [resolvable:$true] %s38_s29 }
  0x14   :  { %s843_s5 = scalar_lea.hbm %s1005_s0, 32 }
  0x15   :  { %p844_p8 = scmp.ne.s32.totalorder %s1005_s0, %s843_s5  ;;  %p847_p9 = scmp.lt.u32.totalorder %s843_s5, %s1005_s0 }
  0x17   :  { %p849_p10 = pnand %p847_p9, %p844_p8 }
  0x19   :  { %852 = shalt.err (!%p849_p10)
}
  0x1a   :  { %s853_s1 = scalar_lea.vmem %s17_s27, 32  ;;  %p858_p12 = scmp.lt.s32.totalorder %s17_s27, %s17_s27 }
  0x1b   :  { %p854_p11 = scmp.ne.s32.totalorder %s17_s27, %s853_s1  ;;  %p859_p13 = scmp.lt.s32.totalorder %s853_s1, %s853_s1 }
  0x1d   :  { %p860_p0 = por %p859_p13, %p858_p12 }
  0x1f   :  { %p861_p1 = pnand %p860_p0, %p854_p11 }
  0x21   :  { %864 = shalt.err (!%p861_p1)
}
  0x22   :  { %19 = dma.hbm_to_vmem [thread:$0]  %s1005_s0, 32, %s17_s27, [#allocation3]  }
  0x23   :  { %s865_s14 = scalar_lea.hbm %s1007_s2, 128 }
  0x24   :  { %p866_p2 = scmp.ne.s32.totalorder %s1007_s2, %s865_s14  ;;  %p869_p3 = scmp.lt.u32.totalorder %s865_s14, %s1007_s2 }
  0x26   :  { %p871_p4 = pnand %p869_p3, %p866_p2 }
  0x28   :  { %874 = shalt.err (!%p871_p4)
}
  0x29   :  { %s875_s19 = scalar_lea.vmem %s39_s29, 128  ;;  %p880_p6 = scmp.lt.s32.totalorder %s39_s29, %s39_s29 }
  0x2a   :  { %p876_p5 = scmp.ne.s32.totalorder %s39_s29, %s875_s19  ;;  %p881_p7 = scmp.lt.s32.totalorder %s875_s19, %s875_s19 }
  0x2c   :  { %p882_p8 = por %p881_p7, %p880_p6 }
  0x2e   :  { %p883_p9 = pnand %p882_p8, %p876_p5 }
  0x30   :  { %886 = shalt.err (!%p883_p9)
}
  0x31   :  { %41 = dma.hbm_to_vmem [thread:$0]  %s1007_s2, 128, %s39_s29, [#allocation5]  }
  0x32   :  { %887 = dma.done.wait [#allocation3], 32  }
  0x33   :  { %888 = vsyncadd [#allocation3], 4294967264 }
  0x34   :  { %889 = dma.done.wait [#allocation5], 5248  }
  0x35   :  { %890 = vsyncadd [#allocation5], 4294962048  ;;  %v896_v0 = vmov 0.0   ;;  %vm897_vm0 = vmmov 0   ;;  %v784_v1 = vld [vmem:[#allocation4] sm:$0xff]   ;;  %v785_v2 = vld [vmem:[#allocation4 + $0x8] sm:$0xff]  }
  0x36   :  { %683 = vmatprep.subr.bf16.mxu0 %v896_v0  ;;  %693 = vmatprep.mubr.msk.bf16.mxu0 %vm897_vm0, %v896_v0  ;;  %v786_v3 = vld [vmem:[#allocation4 + $0x10] sm:$0xff]   ;;  %v789_v4 = vld [vmem:[#allocation4 + $0x40] sm:$0xff]   ;;  %v790_v5 = vld [vmem:[#allocation4 + $0x48] sm:$0xff]   ;;  %vm99_vm1 = vcmask 654336  }
  0x37   :  { %697 = vmatprep.subr.bf16.mxu1 %v896_v0  ;;  %713 = vmatprep.mubr.msk.bf16.mxu1 %vm897_vm0, %v896_v0  ;;  %v787_v6 = vld [vmem:[#allocation4 + $0x18] sm:$0xff]   ;;  %v791_v7 = vld [vmem:[#allocation4 + $0x50] sm:$0xff]   ;;  %v788_v8 = vld [vmem:[#allocation4 + $0x20] sm:$0xff]  }
  0x38   :  { %684 = vmatpush3.bf16.msra.mxu0 %v784_v1  ;;  %698 = vmatpush3.bf16.msra.mxu1 %v789_v4  ;;  %v52_v9 = vld [vmem:[#allocation2] sm:$0x3]  ;;  %v793_v12 = vld [vmem:[#allocation4 + $0x60] sm:$0xff]   ;;  %v794_v13 = vld [vmem:[#allocation4 + $0x68] sm:$0xff]  }
  0x39   :  { %685 = vmatprep.subr.bf16.mxu0 %v896_v0  ;;  %699 = vmatprep.subr.bf16.mxu1 %v896_v0  ;;  %v792_v10 = vld [vmem:[#allocation4 + $0x58] sm:$0xff]   ;;  %v53_v11 = vpack.c.bf16 %v52_v9, %v52_v9  ;;  %v795_v14 = vld [vmem:[#allocation4 + $0x70] sm:$0xff]   ;;  %v797_v16 = vld [vmem:[#allocation4 + $0x80] sm:$0xff]  }
  0x3a   :  { %v796_v15 = vld [vmem:[#allocation4 + $0x78] sm:$0xff]   ;;  %v798_v17 = vld [vmem:[#allocation4 + $0x88] sm:$0xff]   ;;  %v799_v18 = vld [vmem:[#allocation4 + $0x90] sm:$0xff]  }
  0x3b   :  { %v800_v19 = vld [vmem:[#allocation4 + $0x98] sm:$0xff]   ;;  %v801_v20 = vld [vmem:[#allocation4 + $0xa0] sm:$0xff]   ;;  %v802_v21 = vld [vmem:[#allocation4 + $0xa8] sm:$0xff]  }
  0x3c   :  { %686 = vmatpush3.bf16.msra.mxu0 %v785_v2  ;;  %700 = vmatpush3.bf16.msra.mxu1 %v790_v5  ;;  %v598_v22 = vld [vmem:[#allocation6] ss:$0 sm:$0xff]  ;;  %v803_v30 = vld [vmem:[#allocation4 + $0xb0] sm:$0xff]   ;;  %v804_v31 = vld [vmem:[#allocation4 + $0xb8] sm:$0xff]  }
  0x3d   :  { %687 = vmatprep.subr.bf16.mxu0 %v896_v0  ;;  %701 = vmatprep.subr.bf16.mxu1 %v896_v0  ;;  %v805_v32 = vld [vmem:[#allocation4 + $0xc0] sm:$0xff]   ;;  %v806_v33 = vld [vmem:[#allocation4 + $0xc8] sm:$0xff]   ;;  %v807_v34 = vld [vmem:[#allocation4 + $0xd0] sm:$0xff]  }
  0x3e   :  { %v808_v35 = vld [vmem:[#allocation4 + $0xd8] sm:$0xff]   ;;  %v809_v36 = vld [vmem:[#allocation4 + $0xe0] sm:$0xff]   ;;  %v810_v37 = vld [vmem:[#allocation4 + $0xe8] sm:$0xff]  }
  0x3f   :  { %v605_v38 = vld [vmem:[#allocation6 + $0x1] ss:$0 sm:$0xff]  ;;  %v811_v46 = vld [vmem:[#allocation4 + $0xf0] sm:$0xff]   ;;  %v812_v47 = vld [vmem:[#allocation4 + $0xf8] sm:$0xff]  }
  0x40   :  { %688 = vmatpush3.bf16.msra.mxu0 %v786_v3  ;;  %702 = vmatpush3.bf16.msra.mxu1 %v791_v7  ;;  %v813_v48 = vld [vmem:[#allocation4 + $0x100] sm:$0xff]   ;;  %v814_v49 = vld [vmem:[#allocation4 + $0x108] sm:$0xff]   ;;  %v815_v50 = vld [vmem:[#allocation4 + $0x110] sm:$0xff]  }
  0x41   :  { %689 = vmatprep.subr.bf16.mxu0 %v896_v0  ;;  %703 = vmatprep.subr.bf16.mxu1 %v896_v0  ;;  %v816_v51 = vld [vmem:[#allocation4 + $0x118] sm:$0xff]   ;;  %v817_v52 = vld [vmem:[#allocation4 + $0x120] sm:$0xff]   ;;  %v818_v53 = vld [vmem:[#allocation4 + $0x128] sm:$0xff]  }
  0x42   :  { %v614_v54 = vld [vmem:[#allocation6 + $0x2] ss:$0 sm:$0xff]  ;;  %v819_v62 = vld [vmem:[#allocation4 + $0x130] sm:$0xff]   ;;  %v820_v63 = vld [vmem:[#allocation4 + $0x138] sm:$0xff]  }
  0x43   :  { %v623_v1 = vld [vmem:[#allocation6 + $0x3] ss:$0 sm:$0xff]  ;;  %v632_v9 = vld [vmem:[#allocation6 + $0x4] ss:$0 sm:$0xff] }
  0x44   :  { %690 = vmatpush3.bf16.msra.mxu0 %v787_v6  ;;  %704 = vmatpush3.bf16.msra.mxu1 %v792_v10 }
  0x45   :  { %691 = vmatprep.subr.bf16.mxu0 %v896_v0  ;;  %705 = vmatprep.subr.bf16.mxu1 %v896_v0 }
  0x48   :  { %692 = vmatpush3.bf16.msra.mxu0 %v788_v8  ;;  %706 = vmatpush3.bf16.msra.mxu1 %v793_v12 }
  0x49   :  { %717 = vmatprep.subr.bf16.mxu0 %v896_v0  ;;  %707 = vmatprep.subr.bf16.mxu1 %v896_v0 }
  0x4b   :  { %694 = vmatmul.mubr.msk.bf16.vlgmr.msra.gmra.mrb[0].mxu0 %vm99_vm1, %v53_v11 }
  0x4c   :  { %733 = vmatprep.mubr.msk.bf16.mxu0 %vm897_vm0, %v896_v0  ;;  %708 = vmatpush3.bf16.msra.mxu1 %v794_v13 }
  0x4d   :  { %709 = vmatprep.subr.bf16.mxu1 %v896_v0  ;;  %718 = vmatpush3.bf16.msra.mxu0 %v797_v16 }
  0x4e   :  { %719 = vmatprep.subr.bf16.mxu0 %v896_v0 }
  0x50   :  { %710 = vmatpush3.bf16.msra.mxu1 %v795_v14 }
  0x51   :  { %711 = vmatprep.subr.bf16.mxu1 %v896_v0  ;;  %720 = vmatpush3.bf16.msra.mxu0 %v798_v17 }
  0x52   :  { %721 = vmatprep.subr.bf16.mxu0 %v896_v0 }
  0x54   :  { %712 = vmatpush3.bf16.msra.mxu1 %v796_v15 }
  0x55   :  { %737 = vmatprep.subr.bf16.mxu1 %v896_v0  ;;  %722 = vmatpush3.bf16.msra.mxu0 %v799_v18 }
  0x56   :  { %723 = vmatprep.subr.bf16.mxu0 %v896_v0 }
  0x59   :  { %724 = vmatpush3.bf16.msra.mxu0 %v800_v19 }
  0x5a   :  { %725 = vmatprep.subr.bf16.mxu0 %v896_v0 }
  0x5d   :  { %726 = vmatpush3.bf16.msra.mxu0 %v801_v20 }
  0x5e   :  { %727 = vmatprep.subr.bf16.mxu0 %v896_v0 }
  0x61   :  { %728 = vmatpush3.bf16.msra.mxu0 %v802_v21 }
  0x62   :  { %729 = vmatprep.subr.bf16.mxu0 %v896_v0 }
  0x65   :  { %730 = vmatpush3.bf16.msra.mxu0 %v803_v30 }
  0x66   :  { %731 = vmatprep.subr.bf16.mxu0 %v896_v0 }
  0x69   :  { %732 = vmatpush3.bf16.msra.mxu0 %v804_v31 }
  0x6a   :  { %757 = vmatprep.subr.bf16.mxu0 %v896_v0 }
 0x11e   :  { %v137_v23 = vpop.f32.mrb[0].mxu0 }
 0x11f   :  { %v138_v24 = vadd.f32 %v598_v22, %v137_v23  ;;  %v695_v25 = vpop.f32.mrb[1].mxu0 }
 0x120   :  { %v140_v26 = vpop.f32.mrb[2].mxu0 }
 0x121   :  { %v143_v27 = vmax.f32 %v138_v24, 0.0  ;;  %v696_v28 = vpop.f32.mrb[3].mxu0 }
 0x123   :  { %v144_v29 = vpack.c.bf16 %v143_v27, %v143_v27 }
 0x125   :  { %714 = vmatmul.mubr.bf16.vlgmr.msra.gmra.mrb[0].mxu1 %v144_v29 }
 0x126   :  { %753 = vmatprep.mubr.msk.bf16.mxu1 %vm897_vm0, %v896_v0  ;;  %738 = vmatpush3.bf16.msra.mxu1 %v805_v32 }
 0x127   :  { %739 = vmatprep.subr.bf16.mxu1 %v896_v0 }
 0x12a   :  { %740 = vmatpush3.bf16.msra.mxu1 %v806_v33 }
 0x12b   :  { %741 = vmatprep.subr.bf16.mxu1 %v896_v0 }
 0x12e   :  { %742 = vmatpush3.bf16.msra.mxu1 %v807_v34 }
 0x12f   :  { %743 = vmatprep.subr.bf16.mxu1 %v896_v0 }
 0x132   :  { %744 = vmatpush3.bf16.msra.mxu1 %v808_v35 }
 0x133   :  { %745 = vmatprep.subr.bf16.mxu1 %v896_v0 }
 0x136   :  { %746 = vmatpush3.bf16.msra.mxu1 %v809_v36 }
 0x137   :  { %747 = vmatprep.subr.bf16.mxu1 %v896_v0 }
 0x13a   :  { %748 = vmatpush3.bf16.msra.mxu1 %v810_v37 }
 0x13b   :  { %749 = vmatprep.subr.bf16.mxu1 %v896_v0 }
 0x13e   :  { %750 = vmatpush3.bf16.msra.mxu1 %v811_v46 }
 0x13f   :  { %751 = vmatprep.subr.bf16.mxu1 %v896_v0 }
 0x142   :  { %752 = vmatpush3.bf16.msra.mxu1 %v812_v47 }
 0x1f8   :  { %v249_v39 = vpop.f32.mrb[0].mxu1 }
 0x1f9   :  { %v250_v40 = vadd.f32 %v605_v38, %v249_v39  ;;  %v715_v41 = vpop.f32.mrb[1].mxu1 }
 0x1fa   :  { %v252_v42 = vpop.f32.mrb[2].mxu1 }
 0x1fb   :  { %v255_v43 = vmax.f32 %v250_v40, 0.0  ;;  %v716_v44 = vpop.f32.mrb[3].mxu1 }
 0x1fd   :  { %v256_v45 = vpack.c.bf16 %v255_v43, %v255_v43 }
 0x1ff   :  { %734 = vmatmul.mubr.bf16.vlgmr.msra.gmra.mrb[4].mxu0 %v256_v45 }
 0x200   :  { %773 = vmatprep.mubr.msk.bf16.mxu0 %vm897_vm0, %v896_v0  ;;  %758 = vmatpush3.bf16.msra.mxu0 %v813_v48 }
 0x201   :  { %759 = vmatprep.subr.bf16.mxu0 %v896_v0 }
 0x204   :  { %760 = vmatpush3.bf16.msra.mxu0 %v814_v49 }
 0x205   :  { %761 = vmatprep.subr.bf16.mxu0 %v896_v0 }
 0x208   :  { %762 = vmatpush3.bf16.msra.mxu0 %v815_v50 }
 0x209   :  { %763 = vmatprep.subr.bf16.mxu0 %v896_v0 }
 0x20c   :  { %764 = vmatpush3.bf16.msra.mxu0 %v816_v51 }
 0x20d   :  { %765 = vmatprep.subr.bf16.mxu0 %v896_v0 }
 0x210   :  { %766 = vmatpush3.bf16.msra.mxu0 %v817_v52 }
 0x211   :  { %767 = vmatprep.subr.bf16.mxu0 %v896_v0 }
 0x214   :  { %768 = vmatpush3.bf16.msra.mxu0 %v818_v53 }
 0x215   :  { %769 = vmatprep.subr.bf16.mxu0 %v896_v0 }
 0x218   :  { %770 = vmatpush3.bf16.msra.mxu0 %v819_v62 }
 0x219   :  { %771 = vmatprep.subr.bf16.mxu0 %v896_v0 }
 0x21c   :  { %772 = vmatpush3.bf16.msra.mxu0 %v820_v63 }
 0x2d2   :  { %v361_v55 = vpop.f32.mrb[4].mxu0 }
 0x2d3   :  { %v362_v56 = vadd.f32 %v614_v54, %v361_v55  ;;  %v735_v57 = vpop.f32.mrb[5].mxu0 }
 0x2d4   :  { %v364_v58 = vpop.f32.mrb[6].mxu0 }
 0x2d5   :  { %v367_v59 = vmax.f32 %v362_v56, 0.0  ;;  %v736_v60 = vpop.f32.mrb[7].mxu0 }
 0x2d7   :  { %v368_v61 = vpack.c.bf16 %v367_v59, %v367_v59 }
 0x2d9   :  { %754 = vmatmul.mubr.bf16.vlgmr.msra.gmra.mrb[4].mxu1 %v368_v61 }
 0x3ac   :  { %v473_v2 = vpop.f32.mrb[4].mxu1 }
 0x3ad   :  { %v474_v3 = vadd.f32 %v623_v1, %v473_v2  ;;  %v755_v4 = vpop.f32.mrb[5].mxu1 }
 0x3ae   :  { %v476_v5 = vpop.f32.mrb[6].mxu1 }
 0x3af   :  { %v479_v6 = vmax.f32 %v474_v3, 0.0  ;;  %v756_v7 = vpop.f32.mrb[7].mxu1 }
 0x3b1   :  { %v480_v8 = vpack.c.bf16 %v479_v6, %v479_v6 }
 0x3b3   :  { %774 = vmatmul.mubr.bf16.vlgmr.msra.gmra.mrb[8].mxu0 %v480_v8 }
 0x486   :  { %v585_v10 = vpop.f32.mrb[8].mxu0 }
 0x487   :  { %v586_v11 = vadd.f32 %v632_v9, %v585_v10  ;;  %v775_v12 = vpop.f32.mrb[9].mxu0 }
 0x488   :  { %v588_v13 = vpop.f32.mrb[10].mxu0 }
 0x489   :  { %591 = vst [vmem:[%s1008_s3] sm:$0x3] %v586_v11  ;;  %v776_v0 = vpop.f32.mrb[11].mxu0 }
 0x48a   :  { %596 = vsyncpa [#allocation3], 1 }
 0x48b   :  { %597 = vsyncpa [#allocation5], 1 }

</bundles_post_ra>
